<compile_context>
chip_gen: v7x
topology: tpu7x:2x2x1
jax: 0.10.0
libtpu: 0.0.40
codegen_flags: <defaults>
</compile_context>

<pallas_src>
import jax
import jax.numpy as jnp
from jax.experimental import pallas as pl
from jax.experimental.pallas import tpu as pltpu


def maxpool_kernel(x_ref, mask_ref, scores_ref, emb_ref, counts_acc):
    # x_ref:      (TB, N, TD)  token-embedding tile
    # mask_ref:   (TB, 1, N)   attention mask, lane-dense
    # scores_ref: (TB, 1, N)   normalized max-contribution scores (lane-dense)
    # emb_ref:    (TB, 1, TD)  max-pooled sentence-embedding tile
    # counts_acc: (TB, 1, N)   f32 VMEM accumulator of argmax counts
    d = pl.program_id(1)
    nd = pl.num_programs(1)

    @pl.when(d == 0)
    def _init():
        counts_acc[...] = jnp.zeros_like(counts_acc)

    x = x_ref[...]                                             # (TB, N, TD)
    N = x.shape[1]

    # max over the token axis -> pooled values for this D tile
    vals = jnp.max(x, axis=1, keepdims=True)                   # (TB, 1, TD)
    emb_ref[...] = vals.astype(emb_ref.dtype)

    # first-occurrence argmax over the token axis (matches torch.max(dim) ties)
    n_iota = jax.lax.broadcasted_iota(jnp.int32, x.shape, 1)   # (TB, N, TD)
    is_max = x == vals                                         # (TB, N, TD)
    idx = jnp.min(jnp.where(is_max, n_iota, N), axis=1, keepdims=True)  # (TB, 1, TD)

    # per-token hit counts for this D tile (lane reduce), then one small
    # XLU transpose to the lane-dense (TB, 1, N) accumulator layout.
    hits = (idx == n_iota).astype(jnp.float32)                 # (TB, N, TD)
    counts_nl = jnp.sum(hits, axis=2, keepdims=True)           # (TB, N, 1)
    counts_acc[...] += jnp.transpose(counts_nl, (0, 2, 1))     # (TB, 1, N)

    @pl.when(d == nd - 1)
    def _finalize():
        masked = counts_acc[...] * mask_ref[...]               # (TB, 1, N)
        denom = jnp.sum(masked, axis=2, keepdims=True)         # (TB, 1, 1)
        scores_ref[...] = masked * pl.reciprocal(denom)        # exact recip (EUP)


def _pick_block_b(B: int) -> int:
    for tb in (8, 4, 2, 1):
        if B % tb == 0:
            return tb
    return 1


def _pick_block_d(D: int, N: int, TB: int) -> int:
    """~4 MiB f32 x-block per buffer, TD a multiple of 128 dividing D, else full D."""
    target_elems = (4 * 1024 * 1024) // 4
    td = target_elems // max(N * TB, 1)
    td = max(128, min(2048, (td // 128) * 128))
    if D <= td or D % 128 != 0:
        return D
    while td >= 128 and D % td != 0:
        td -= 128
    return td if td >= 128 else D


def max_pooling_layer(token_embeddings, attention_mask,
                      mask_special_tokens: bool = False,
                      *, block_b: int | None = None, block_d: int | None = None):
    """Pallas implementation of MaxPoolingLayer.forward.

    token_embeddings: (B, N, D) float
    attention_mask:   (B, N)    {0, 1}
    returns dict with 'scores' (B, N) float32 and 'sentence_embedding' (B, D)
    """
    B, N, D = token_embeddings.shape
    mask = attention_mask.astype(jnp.float32)

    if mask_special_tokens:
        # index-update glue stays in plain JAX (same as the torch clone+fill)
        sep_cols = (jnp.sum(mask, axis=1) - 1).astype(jnp.int32)      # (B,)
        rows = jnp.arange(B, dtype=jnp.int32)
        mask = mask.at[rows, sep_cols].set(0.0)
        mask = mask.at[:, 0].set(0.0)

    # lane-dense mask: tokens on the lane axis
    mask3 = mask.reshape(B, 1, N)

    TB = block_b if block_b is not None else _pick_block_b(B)
    if B % TB != 0:
        TB = 1
    TD = block_d if block_d is not None else _pick_block_d(D, N, TB)
    if D % TD != 0:
        TD = D

    grid = (B // TB, D // TD)

    scores3, emb3 = pl.pallas_call(
        maxpool_kernel,
        out_shape=(
            jax.ShapeDtypeStruct((B, 1, N), jnp.float32),
            jax.ShapeDtypeStruct((B, 1, D), token_embeddings.dtype),
        ),
        grid=grid,
        in_specs=[
            pl.BlockSpec((TB, N, TD), lambda b, d: (b, 0, d)),
            pl.BlockSpec((TB, 1, N), lambda b, d: (b, 0, 0)),
        ],
        out_specs=(
            pl.BlockSpec((TB, 1, N), lambda b, d: (b, 0, 0)),   # resident across d
            pl.BlockSpec((TB, 1, TD), lambda b, d: (b, 0, d)),
        ),
        scratch_shapes=[pltpu.VMEM((TB, 1, N), jnp.float32)],
        compiler_params=pltpu.CompilerParams(
            dimension_semantics=("parallel", "arbitrary"),
            vmem_limit_bytes=32 << 20),
    )(token_embeddings, mask3)

    return {
        "scores": scores3.reshape(B, N),
        "sentence_embedding": emb3.reshape(B, D),
    }


def _reference(token_embeddings, attention_mask):
    """Plain-JAX reference mirroring the PyTorch forward (mask_special_tokens=False)."""
    x = token_embeddings
    B, N, D = x.shape
    vals = jnp.max(x, axis=1)
    inds = jnp.argmax(x, axis=1)                                  # (B, D) first occurrence
    one_hot = (inds[:, None, :] == jnp.arange(N)[None, :, None])  # (B, N, D)
    counts = jnp.sum(one_hot.astype(jnp.float32), axis=2)         # (B, N)
    masked = counts * attention_mask.astype(jnp.float32)
    scores = masked / jnp.sum(masked, axis=-1, keepdims=True)
    return scores, vals


if __name__ == "__main__":
    key = jax.random.PRNGKey(0)

    # --- small single-tile case ---
    B, N, D = 2, 8, 32
    x = jax.random.normal(key, (B, N, D), dtype=jnp.float32)
    attention_mask = jnp.ones((B, N), dtype=jnp.int32)
    attention_mask = attention_mask.at[1, -2:].set(0)            # pad last 2 tokens of row 1

    out = max_pooling_layer(x, attention_mask, mask_special_tokens=False)
    jax.block_until_ready(out)

    ref_scores, ref_vals = _reference(x, attention_mask)
    assert out["scores"].shape == (B, N)
    assert out["sentence_embedding"].shape == (B, D)
    assert jnp.allclose(out["sentence_embedding"], ref_vals, atol=1e-6)
    assert jnp.allclose(out["scores"], ref_scores, atol=1e-6)

    # --- exercise the D-tiled accumulator path (multiple d grid steps) ---
    B2, N2, D2 = 2, 8, 256
    x2 = jax.random.normal(jax.random.PRNGKey(1), (B2, N2, D2), dtype=jnp.float32)
    mask2 = jnp.ones((B2, N2), dtype=jnp.int32).at[0, -3:].set(0)
    out_t = max_pooling_layer(x2, mask2, mask_special_tokens=False, block_d=128)
    jax.block_until_ready(out_t)
    ref_scores2, ref_vals2 = _reference(x2, mask2)
    assert jnp.allclose(out_t["sentence_embedding"], ref_vals2, atol=1e-6)
    assert jnp.allclose(out_t["scores"], ref_scores2, atol=1e-6)

    # --- smoke test of the special-token-masking path (glue is plain JAX) ---
    out2 = max_pooling_layer(x, attention_mask, mask_special_tokens=True)
    jax.block_until_ready(out2)

    print("KERNEL_OK")
</pallas_src>

<mosaic_0001>
module attributes {stable_mosaic.version = 11 : i64} {
  func.func @maxpool_kernel(%arg0: i32, %arg1: i32, %arg2: memref<2x8x32xf32, #tpu.memory_space<vmem>>, %arg3: memref<2x1x8xf32, #tpu.memory_space<vmem>>, %arg4: memref<2x1x8xf32, #tpu.memory_space<vmem>>, %arg5: memref<2x1x32xf32, #tpu.memory_space<vmem>>, %arg6: memref<2x1x8xf32, #tpu.memory_space<vmem>>) attributes {dimension_semantics = [#tpu.dimension_semantics<parallel>, #tpu.dimension_semantics<arbitrary>], iteration_bounds = array<i64: 1, 1>, scalar_prefetch = 0 : i64, scratch_operands = 1 : i64, tpu.core_type = #tpu.core_type<tc>, window_params = [{transform_indices = @transform_0, window_bounds = array<i64: 2, 8, 32>}, {transform_indices = @transform_1, window_bounds = array<i64: 2, 1, 8>}, {transform_indices = @transform_2, window_bounds = array<i64: 2, 1, 8>}, {transform_indices = @transform_3, window_bounds = array<i64: 2, 1, 32>}]} {
    %c0_i32 = arith.constant 0 : i32
    %0 = arith.cmpi eq, %arg1, %c0_i32 : i32
    %1 = arith.extui %0 : i1 to i32
    %c0_i32_0 = arith.constant 0 : i32
    %2 = arith.cmpi ne, %1, %c0_i32_0 : i32
    scf.if %2 {
      %cst_16 = arith.constant 0.000000e+00 : f32
      %27 = vector.broadcast %cst_16 : f32 to vector<2x1x8xf32>
      %c0_17 = arith.constant 0 : index
      %c0_18 = arith.constant 0 : index
      %c0_19 = arith.constant 0 : index
      %28 = vector.load %arg6[%c0_17, %c0_18, %c0_19] : memref<2x1x8xf32, #tpu.memory_space<vmem>>, vector<2x1x8xf32>
      tpu.vector_store %arg6[%c0_17, %c0_18, %c0_19], %27 {strides = array<i32>} : memref<2x1x8xf32, #tpu.memory_space<vmem>>, vector<2x1x8xf32>,
    } else {
    }
    %c0 = arith.constant 0 : index
    %c0_1 = arith.constant 0 : index
    %c0_2 = arith.constant 0 : index
    %3 = vector.load %arg2[%c0, %c0_1, %c0_2] : memref<2x8x32xf32, #tpu.memory_space<vmem>>, vector<2x8x32xf32>
    %cst = arith.constant dense<0xFF800000> : vector<2x32xf32>
    %4 = vector.multi_reduction <maximumf>, %3, %cst [1] : vector<2x8x32xf32> to vector<2x32xf32>
    %5 = vector.shape_cast %4 : vector<2x32xf32> to vector<2x1x32xf32>
    %c0_3 = arith.constant 0 : index
    %c0_4 = arith.constant 0 : index
    %c0_5 = arith.constant 0 : index
    %6 = vector.load %arg5[%c0_3, %c0_4, %c0_5] : memref<2x1x32xf32, #tpu.memory_space<vmem>>, vector<2x1x32xf32>
    tpu.vector_store %arg5[%c0_3, %c0_4, %c0_5], %5 {strides = array<i32>} : memref<2x1x32xf32, #tpu.memory_space<vmem>>, vector<2x1x32xf32>,
    %7 = tpu.iota {dimensions = array<i32: 1>} : vector<2x8x32xi32>
    %8 = vector.broadcast %5 : vector<2x1x32xf32> to vector<2x8x32xf32>
    %9 = arith.cmpf oeq, %3, %8 : vector<2x8x32xf32>
    %c8_i32 = arith.constant 8 : i32
    %10 = vector.broadcast %c8_i32 : i32 to vector<2x8x32xi32>
    %11 = arith.select %9, %7, %10 : vector<2x8x32xi1>, vector<2x8x32xi32>
    %cst_6 = arith.constant dense<2147483647> : vector<2x32xi32>
    %12 = vector.multi_reduction <minsi>, %11, %cst_6 [1] : vector<2x8x32xi32> to vector<2x32xi32>
    %13 = vector.shape_cast %12 : vector<2x32xi32> to vector<2x1x32xi32>
    %14 = vector.broadcast %13 : vector<2x1x32xi32> to vector<2x8x32xi32>
    %15 = arith.cmpi eq, %14, %7 : vector<2x8x32xi32>
    %16 = arith.extui %15 : vector<2x8x32xi1> to vector<2x8x32xi32>
    %17 = arith.sitofp %16 : vector<2x8x32xi32> to vector<2x8x32xf32>
    %cst_7 = arith.constant dense<0.000000e+00> : vector<2x8xf32>
    %18 = vector.multi_reduction <add>, %17, %cst_7 [2] : vector<2x8x32xf32> to vector<2x8xf32>
    %19 = vector.shape_cast %18 : vector<2x8xf32> to vector<2x8x1xf32>
    %c0_8 = arith.constant 0 : index
    %c0_9 = arith.constant 0 : index
    %c0_10 = arith.constant 0 : index
    %20 = vector.load %arg6[%c0_8, %c0_9, %c0_10] : memref<2x1x8xf32, #tpu.memory_space<vmem>>, vector<2x1x8xf32>
    %21 = tpu.transpose %19, [0, 2, 1] : vector<2x8x1xf32> -> vector<2x1x8xf32>
    %22 = arith.addf %20, %21 : vector<2x1x8xf32>
    %c0_11 = arith.constant 0 : index
    %c0_12 = arith.constant 0 : index
    %c0_13 = arith.constant 0 : index
    %23 = vector.load %arg6[%c0_11, %c0_12, %c0_13] : memref<2x1x8xf32, #tpu.memory_space<vmem>>, vector<2x1x8xf32>
    tpu.vector_store %arg6[%c0_11, %c0_12, %c0_13], %22 {strides = array<i32>} : memref<2x1x8xf32, #tpu.memory_space<vmem>>, vector<2x1x8xf32>,
    %c0_i32_14 = arith.constant 0 : i32
    %24 = arith.cmpi eq, %arg1, %c0_i32_14 : i32
    %25 = arith.extui %24 : i1 to i32
    %c0_i32_15 = arith.constant 0 : i32
    %26 = arith.cmpi ne, %25, %c0_i32_15 : i32
    scf.if %26 {
      %c0_16 = arith.constant 0 : index
      %c0_17 = arith.constant 0 : index
      %c0_18 = arith.constant 0 : index
      %27 = vector.load %arg6[%c0_16, %c0_17, %c0_18] : memref<2x1x8xf32, #tpu.memory_space<vmem>>, vector<2x1x8xf32>
      %c0_19 = arith.constant 0 : index
      %c0_20 = arith.constant 0 : index
      %c0_21 = arith.constant 0 : index
      %28 = vector.load %arg3[%c0_19, %c0_20, %c0_21] : memref<2x1x8xf32, #tpu.memory_space<vmem>>, vector<2x1x8xf32>
      %29 = arith.mulf %27, %28 : vector<2x1x8xf32>
      %cst_22 = arith.constant dense<0.000000e+00> : vector<2x1xf32>
      %30 = vector.multi_reduction <add>, %29, %cst_22 [2] : vector<2x1x8xf32> to vector<2x1xf32>
      %31 = vector.shape_cast %30 : vector<2x1xf32> to vector<2x1x1xf32>
      %32 = tpu.reciprocal %31 : vector<2x1x1xf32> -> vector<2x1x1xf32>
      %33 = vector.broadcast %32 : vector<2x1x1xf32> to vector<2x1x8xf32>
      %34 = arith.mulf %29, %33 : vector<2x1x8xf32>
      %c0_23 = arith.constant 0 : index
      %c0_24 = arith.constant 0 : index
      %c0_25 = arith.constant 0 : index
      %35 = vector.load %arg4[%c0_23, %c0_24, %c0_25] : memref<2x1x8xf32, #tpu.memory_space<vmem>>, vector<2x1x8xf32>
      tpu.vector_store %arg4[%c0_23, %c0_24, %c0_25], %34 {strides = array<i32>} : memref<2x1x8xf32, #tpu.memory_space<vmem>>, vector<2x1x8xf32>,
    } else {
    }
    return
  }
  func.func @transform_0(%arg0: i32, %arg1: i32) -> (i32, i32, i32) {
    %c0_i32 = arith.constant 0 : i32
    %c0_i32_0 = arith.constant 0 : i32
    return %arg0, %c0_i32, %arg1 : i32, i32, i32
  }
  func.func @transform_1(%arg0: i32, %arg1: i32) -> (i32, i32, i32) {
    %c0_i32 = arith.constant 0 : i32
    %c0_i32_0 = arith.constant 0 : i32
    %c0_i32_1 = arith.constant 0 : i32
    return %arg0, %c0_i32, %c0_i32_0 : i32, i32, i32
  }
  func.func @transform_2(%arg0: i32, %arg1: i32) -> (i32, i32, i32) {
    %c0_i32 = arith.constant 0 : i32
    %c0_i32_0 = arith.constant 0 : i32
    %c0_i32_1 = arith.constant 0 : i32
    return %arg0, %c0_i32, %c0_i32_0 : i32, i32, i32
  }
  func.func @transform_3(%arg0: i32, %arg1: i32) -> (i32, i32, i32) {
    %c0_i32 = arith.constant 0 : i32
    %c0_i32_0 = arith.constant 0 : i32
    return %arg0, %c0_i32, %arg1 : i32, i32, i32
  }
}

</mosaic_0001>

<bundles_post_ra>
// kernel: tpu_custom_call.1
= control target key start
LH: loop header
LB: loop body
LE: loop exit
PB: predicated region body
PF: predicated region fallthrough
CT: control target
= control target key end

     0   :  { %9 = vsyncpa [#allocation4], 0  ;;  %s395_s0 = inlined_call_operand.hbm [shape: f32[2,8,32], index: 0, kind: input, shape index: {}]   ;;  %s396_s1 = inlined_call_operand.vmem [shape: f32[2,1,8], index: 1, kind: input, shape index: {}]   ;;  %s397_s2 = inlined_call_operand.hbm [shape: f32[2,1,8], index: 2, kind: output, shape index: {0}]   ;;  %s398_s3 = inlined_call_operand.hbm [shape: f32[2,1,32], index: 3, kind: output, shape index: {1}]  }
   0x1   :  { %10 = vsyncpa [#allocation5], 0 }
   0x2   :  { %11 = vsyncpa [#allocation8], 0  ;;  %s305_s12 = smov [#allocation3]   ;;  %s233_s16 = scalar_lea.hbm %s395_s0, 256 }
   0x3   :  { %s17_s13 = sshll.u32 %s305_s12, 4  ;;  %p234_p0 = scmp.ne.s32.totalorder %s395_s0, %s233_s16  ;;  %s18_s13 = int_to_ptr.vmem [resolvable:$true] %s17_s13 }
   0x4   :  { %p237_p1 = scmp.lt.u32.totalorder %s233_s16, %s395_s0 }
   0x6   :  { %p239_p2 = pnand %p237_p1, %p234_p0 }
   0x8   :  { %242 = shalt.err (!%p239_p2)
}
   0x9   :  { %s243_s21 = scalar_lea.vmem %s18_s13, 256  ;;  %p248_p4 = scmp.lt.s32.totalorder %s18_s13, %s18_s13 }
   0xa   :  { %p244_p3 = scmp.ne.s32.totalorder %s18_s13, %s243_s21  ;;  %p249_p5 = scmp.lt.s32.totalorder %s243_s21, %s243_s21 }
   0xc   :  { %p250_p6 = por %p249_p5, %p248_p4 }
   0xe   :  { %p251_p7 = pnand %p250_p6, %p244_p3 }
  0x10   :  { %254 = shalt.err (!%p251_p7)
}
  0x11   :  { %s306_s22 = smov 128   ;;  %s307_s23 = smov 8  }
  0x12   :  { %23 = dma.hbm_to_vmem [thread:$0]  %s395_s0, 256, %s18_s13, [#allocation4], %s306_s22, %s306_s22, %s307_s23  }
  0x13   :  { %299 = dma.done.wait [#allocation4], 256  }
  0x14   :  { %300 = vsyncadd [#allocation4], 4294967040  ;;  %vm33_vm0 = vcmask 57344   ;;  %v308_v0 = vmov 0.0   ;;  %vm38_vm1 = vcmask 261120   ;;  %v36_v1 = vld [vmem:[#allocation3] sm:$0xff]  ;;  %v56_v11 = vlaneseq }
  0x15   :  { %34 = vst.msk [vmem:[#allocation2] sm:$0x1] %vm33_vm0, %v308_v0  ;;  %35 = vst.msk [vmem:[#allocation2 + $0x1] sm:$0x1] %vm33_vm0, %v308_v0  ;;  %v37_v2 = vld [vmem:[#allocation3 + $0x8] sm:$0xff]  ;;  %v39_v3 = vsel %vm38_vm1, %v36_v1, -inf }
  0x16   :  { %v46_v4 = vsel %vm38_vm1, %v37_v2, -inf  ;;  %v40_v5 = vrot.slane %v39_v3, 4  ;;  %v57_v16 = vshrl.u32 %v56_v11, 7  ;;  %v170_v47 = vld [vmem:[%s396_s1] sm:$0x1]  ;;  %vm53_vm12 = vcmask 253952  }
  0x17   :  { %v47_v6 = vrot.slane %v46_v4, 4  ;;  %v171_v50 = vld [vmem:[%s396_s1 + $0x1] sm:$0x1]  ;;  %s309_s29 = smov [#allocation7]  }
  0x18   :  { %v41_v7 = vmax.f32 %v39_v3, %v40_v5  ;;  %s203_s30 = sshll.u32 %s309_s29, 4  ;;  %s204_s30 = int_to_ptr.vmem [resolvable:$true] %s203_s30 }
  0x19   :  { %v48_v8 = vmax.f32 %v46_v4, %v47_v6  ;;  %s255_s4 = scalar_lea.vmem %s204_s30, 32  ;;  %p260_p9 = scmp.lt.s32.totalorder %s204_s30, %s204_s30 }
  0x1a   :  { %v42_v9 = vrot.slane %v41_v7, 2  ;;  %p256_p8 = scmp.ne.s32.totalorder %s204_s30, %s255_s4  ;;  %p261_p10 = scmp.lt.s32.totalorder %s255_s4, %s255_s4 }
  0x1b   :  { %v49_v10 = vrot.slane %v48_v8, 2 }
  0x1c   :  { %v43_v12 = vmax.f32 %v41_v7, %v42_v9  ;;  %v94_v41 = vld [vmem:[#allocation2] sm:$0x1]  ;;  %v95_v44 = vld [vmem:[#allocation2 + $0x1] sm:$0x1]  ;;  %p262_p11 = por %p261_p10, %p260_p9 }
  0x1d   :  { %v50_v13 = vmax.f32 %v48_v8, %v49_v10 }
  0x1e   :  { %v44_v14 = vrot.slane %v43_v12, 1  ;;  %p263_p12 = pnand %p262_p11, %p256_p8 }
  0x1f   :  { %v51_v15 = vrot.slane %v50_v13, 1 }
  0x20   :  { %v45_v17 = vmax.f32 %v43_v12, %v44_v14 }
  0x21   :  { %v52_v18 = vmax.f32 %v50_v13, %v51_v15 }
  0x22   :  { %vm58_vm2 = vcmp.eq.f32.partialorder %v36_v1, %v45_v17  ;;  %54 = vst.msk [vmem:[#allocation7] sm:$0x1] %vm53_vm12, %v45_v17 }
  0x23   :  { %vm59_vm3 = vcmp.eq.f32.partialorder %v37_v2, %v52_v18  ;;  %v60_v19 = vsel %vm58_vm2, %v57_v16, 8  ;;  %55 = vst.msk [vmem:[#allocation7 + $0x1] sm:$0x1] %vm53_vm12, %v52_v18 }
  0x24   :  { %v61_v20 = vsel %vm59_vm3, %v57_v16, 8  ;;  %v62_v21 = vsel %vm38_vm1, %v60_v19, 2147483647 }
  0x25   :  { %v72_v22 = vsel %vm38_vm1, %v61_v20, 2147483647  ;;  %v63_v23 = vrot.slane %v62_v21, 4 }
  0x26   :  { %v73_v24 = vrot.slane %v72_v22, 4 }
  0x27   :  { %vm64_vm4 = vcmp.lt.s32.totalorder %v62_v21, %v63_v23 }
  0x28   :  { %vm74_vm5 = vcmp.lt.s32.totalorder %v72_v22, %v73_v24  ;;  %v65_v25 = vsel %vm64_vm4, %v62_v21, %v63_v23 }
  0x29   :  { %v75_v26 = vsel %vm74_vm5, %v72_v22, %v73_v24  ;;  %v66_v27 = vrot.slane %v65_v25, 2 }
  0x2a   :  { %v76_v28 = vrot.slane %v75_v26, 2 }
  0x2b   :  { %vm67_vm6 = vcmp.lt.s32.totalorder %v65_v25, %v66_v27 }
  0x2c   :  { %vm77_vm7 = vcmp.lt.s32.totalorder %v75_v26, %v76_v28  ;;  %v68_v29 = vsel %vm67_vm6, %v65_v25, %v66_v27 }
  0x2d   :  { %v78_v30 = vsel %vm77_vm7, %v75_v26, %v76_v28  ;;  %v69_v31 = vrot.slane %v68_v29, 1 }
  0x2e   :  { %v79_v32 = vrot.slane %v78_v30, 1 }
  0x2f   :  { %vm70_vm8 = vcmp.lt.s32.totalorder %v68_v29, %v69_v31 }
  0x30   :  { %vm80_vm9 = vcmp.lt.s32.totalorder %v78_v30, %v79_v32  ;;  %v71_v33 = vsel %vm70_vm8, %v68_v29, %v69_v31 }
  0x31   :  { %v81_v34 = vsel %vm80_vm9, %v78_v30, %v79_v32  ;;  %vm82_vm10 = vcmp.eq.s32.totalorder %v71_v33, %v57_v16 }
  0x32   :  { %vm83_vm11 = vcmp.eq.s32.totalorder %v81_v34, %v57_v16  ;;  %v219_v35 = vsel %vm82_vm10, 1.0, %v308_v0 }
  0x33   :  { %v220_v36 = vsel %vm83_vm11, 1.0, %v308_v0  ;;  %v88_v37 = vsel %vm38_vm1, %v219_v35, 0.0 }
  0x34   :  { %89 = vadd.xlane.f32.xlu0 %v88_v37  ;;  %v91_v38 = vsel %vm38_vm1, %v220_v36, 0.0 }
  0x38   :  { %92 = vadd.xlane.f32.xlu0 %v91_v38 }
  0xc1   :  { %v90_v39 = vpop.xlane.xlu0 %89 }
  0xc2   :  { %96 = vxpose.xlu1.b32.start.end [1/1] (short) (narrow) %v90_v39, 8 }
  0xc5   :  { %v93_v40 = vpop.xlane.xlu0 %92 }
  0xc6   :  { %128 = vxpose.xlu1.b32.start.end [1/1] (short) (narrow) %v93_v40, 8 }
 0x142   :  { %v112_v42 = vpop.trf.xlu1 }
 0x143   :  { %v160_v43 = vadd.f32 %v112_v42, %v94_v41 }
 0x145   :  { %163 = vst.msk [vmem:[#allocation2] sm:$0x1] %vm33_vm0, %v160_v43 }
 0x146   :  { %v144_v45 = vpop.trf.xlu1 }
 0x147   :  { %v161_v46 = vadd.f32 %v144_v45, %v95_v44 }
 0x149   :  { %164 = vst.msk [vmem:[#allocation2 + $0x1] sm:$0x1] %vm33_vm0, %v161_v46 }
 0x14c   :  { %v168_v48 = vld [vmem:[#allocation2] sm:$0x1] }
 0x14d   :  { %v172_v49 = vmul.f32 %v170_v47, %v168_v48 }
 0x14f   :  { %v174_v51 = vsel %vm33_vm0, %v172_v49, 0.0 }
 0x150   :  { %175 = vadd.xlane.f32.xlu0 %v174_v51  ;;  %v169_v52 = vld [vmem:[#allocation2 + $0x1] sm:$0x1] }
 0x151   :  { %v173_v53 = vmul.f32 %v171_v50, %v169_v52 }
 0x153   :  { %v177_v54 = vsel %vm33_vm0, %v173_v53, 0.0 }
 0x154   :  { %178 = vadd.xlane.f32.xlu1 %v177_v54 }
 0x155   :  { %266 = shalt.err (!%p263_p12)
}
 0x156   :  { %s267_s6 = scalar_lea.hbm %s398_s3, 32 }
 0x157   :  { %p268_p13 = scmp.ne.s32.totalorder %s398_s3, %s267_s6  ;;  %p271_p0 = scmp.lt.u32.totalorder %s267_s6, %s398_s3 }
 0x159   :  { %p273_p1 = pnand %p271_p0, %p268_p13 }
 0x15b   :  { %276 = shalt.err (!%p273_p1)
}
 0x15c   :  { %s310_s11 = smov 16   ;;  %s311_s12 = smov 1  }
 0x15d   :  { %209 = dma.vmem_to_hbm [thread:$0]  %s204_s30, 32, %s398_s3, [#allocation8], %s310_s11, %s310_s11, %s311_s12  }
 0x15e   :  { %s312_s15 = smov [#allocation6]  }
 0x15f   :  { %s191_s16 = sshll.u32 %s312_s15, 4  ;;  %s192_s16 = int_to_ptr.vmem [resolvable:$true] %s191_s16 }
 0x160   :  { %s277_s17 = scalar_lea.vmem %s192_s16, 32  ;;  %p282_p3 = scmp.lt.s32.totalorder %s192_s16, %s192_s16 }
 0x161   :  { %p278_p2 = scmp.ne.s32.totalorder %s192_s16, %s277_s17  ;;  %p283_p4 = scmp.lt.s32.totalorder %s277_s17, %s277_s17 }
 0x163   :  { %p284_p5 = por %p283_p4, %p282_p3 }
 0x165   :  { %p285_p6 = pnand %p284_p5, %p278_p2 }
 0x1dd   :  { %v176_v55 = vpop.xlane.xlu0 %175 }
 0x1de   :  { %229 = vrcp.f32 %v176_v55 }
 0x1e1   :  { %v179_v56 = vpop.xlane.xlu1 %178 }
 0x1e2   :  { %231 = vrcp.f32 %v179_v56 }
 0x1e8   :  { %v230_v57 = vpop.eup %229 }
 0x1e9   :  { %v182_v58 = vmul.f32 %v230_v57, %v172_v49 }
 0x1eb   :  { %184 = vst.msk [vmem:[#allocation6] sm:$0x1] %vm33_vm0, %v182_v58 }
 0x1ec   :  { %v232_v59 = vpop.eup %231 }
 0x1ed   :  { %v183_v60 = vmul.f32 %v232_v59, %v173_v53 }
 0x1ef   :  { %185 = vst.msk [vmem:[#allocation6 + $0x1] sm:$0x1] %vm33_vm0, %v183_v60 }
 0x1f0   :  { %288 = shalt.err (!%p285_p6)
}
 0x1f1   :  { %s289_s19 = scalar_lea.hbm %s397_s2, 32 }
 0x1f2   :  { %p290_p7 = scmp.ne.s32.totalorder %s397_s2, %s289_s19  ;;  %p293_p8 = scmp.lt.u32.totalorder %s289_s19, %s397_s2 }
 0x1f4   :  { %p295_p9 = pnand %p293_p8, %p290_p7 }
 0x1f6   :  { %298 = shalt.err (!%p295_p9)
}
 0x1f7   :  { %197 = dma.vmem_to_hbm [thread:$0]  %s192_s16, 32, %s397_s2, [#allocation5], %s310_s11, %s310_s11, %s311_s12  }
 0x1f8   :  { %301 = dma.done.wait [#allocation5], 32  }
 0x1f9   :  { %302 = vsyncadd [#allocation5], 4294967264 }
 0x1fa   :  { %303 = dma.done.wait [#allocation8], 32  }
 0x1fb   :  { %304 = vsyncadd [#allocation8], 4294967264 }
 0x1fc   :  { %216 = vsyncpa [#allocation4], 1 }
 0x1fd   :  { %217 = vsyncpa [#allocation5], 1 }
 0x1fe   :  { %218 = vsyncpa [#allocation8], 1 }

</bundles_post_ra>
